<compile_context>
chip_gen: v7x
topology: tpu7x:2x2x1
jax: 0.10.0
libtpu: 0.0.40
codegen_flags: <defaults>
</compile_context>

<pallas_src>
import functools
from typing import NamedTuple

import jax
import jax.numpy as jnp
from jax.experimental import pallas as pl
from jax.experimental.pallas import tpu as pltpu


_VMEM_BUDGET_BYTES = 24 * 1024 * 1024   # conservative; fits v7x's 32 MiB scoped default
_VMEM_LIMIT_BYTES = 32 * 1024 * 1024    # <= v7x 64 MiB physical; raises v5e's 16 MiB default


def _round_up(x, m):
    return ((x + m - 1) // m) * m


def _twolayer_kernel(x_ref, w1_ref, b1_ref, w2_ref, b2_ref, o_ref):
    # x:  (TB, Dp) f32/bf16   w1: (Dp, Hp) bf16   b1: (1, Hp) f32
    # w2: (Hp, Cp) bf16       b2: (1, Cp)  f32    o:  (TB, Cp) out_dtype
    x = x_ref[...].astype(jnp.bfloat16)          # in-kernel cast: no wrapper bf16 copy
    h = jnp.dot(x, w1_ref[...], preferred_element_type=jnp.float32)
    h = h + b1_ref[...]                          # f32 bias add (broadcast over batch)
    s = jax.nn.sigmoid(h)                        # f32 EUP transcendental
    out = jnp.dot(s.astype(jnp.bfloat16), w2_ref[...],
                  preferred_element_type=jnp.float32)
    o_ref[...] = (out + b2_ref[...]).astype(o_ref.dtype)   # lane-dense (TB, Cp) store


class TwoLayerParams(NamedTuple):
    """Padded, bf16-cast parameters produced ONCE by prepare_params()."""
    w1: jax.Array        # (D_pad, H_pad) bf16
    b1: jax.Array        # (1, H_pad)     f32
    w2: jax.Array        # (H_pad, C_pad) bf16
    b2: jax.Array        # (1, C_pad)     f32
    input_dim: int
    num_classes: int


def prepare_params(w1, b1, w2, b2):
    """Pad + cast weights once (hoisted out of the per-forward-call path).

    w1: (D, hidden)   b1: (hidden,)   w2: (hidden, num_classes)   b2: (num_classes,)
    """
    D, H = w1.shape
    C = w2.shape[1]
    D_pad = _round_up(D, 128)
    H_pad = _round_up(max(H, 128), 128)   # 128-lane multiple (no forced 256 padding)
    C_pad = _round_up(max(C, 128), 128)   # lane-dense output slab (unmasked vst)

    w1p = jnp.pad(w1, ((0, D_pad - D), (0, H_pad - H))).astype(jnp.bfloat16)
    b1p = jnp.pad(b1.reshape(1, H), ((0, 0), (0, H_pad - H))).astype(jnp.float32)
    # Zero-fill of the padded hidden rows of w2 (and padded b1 lanes) is
    # load-bearing: sigmoid(0)=0.5 would otherwise leak into real outputs.
    w2p = jnp.pad(w2, ((0, H_pad - H), (0, C_pad - C))).astype(jnp.bfloat16)
    b2p = jnp.pad(b2.reshape(1, C), ((0, 0), (0, C_pad - C))).astype(jnp.float32)
    return TwoLayerParams(w1p, b1p, w2p, b2p, D, C)


def _choose_tile_b(B, D_pad, C_pad, x_itemsize, out_itemsize, resident_bytes,
                   requested_tb):
    """VMEM-budgeted batch tile; guarantees >=2 grid steps when B >= 16."""
    tb = _round_up(min(int(requested_tb), _round_up(max(B, 8), 8)), 8)
    # Double-buffered x block + double-buffered out block, bytes per batch row.
    per_row = 2 * D_pad * x_itemsize + 2 * C_pad * out_itemsize
    while tb > 8 and resident_bytes + tb * per_row > _VMEM_BUDGET_BYTES:
        tb = max(8, _round_up(tb // 2, 8))
    # v7x megacore: keep >= 2 grid steps so the "parallel" batch axis actually
    # splits across both TensorCores (no-op on single-TC v5e/v6e).
    if B >= 16:
        half = _round_up(_round_up(B, 8) // 2, 8)
        tb = min(tb, max(8, half))
    return tb


@functools.partial(
    jax.jit,
    static_argnames=("tb", "num_classes", "out_dtype", "single_buffer_weights"))
def _forward(x_nchw, w1p, b1p, w2p, b2p, *, tb, num_classes, out_dtype,
             single_buffer_weights):
    B = x_nchw.shape[0]
    D_pad, H_pad = w1p.shape
    C_pad = w2p.shape[1]

    # nn.Flatten: flatten all non-batch dims (row-major); free in XLA.
    x2d = x_nchw.reshape(B, -1)
    D = x2d.shape[1]
    B_pad = _round_up(B, tb)
    if B_pad != B or D_pad != D:
        # Zero-pad only when strictly needed (padding cannot leak into real rows).
        x2d = jnp.pad(x2d, ((0, B_pad - B), (0, D_pad - D)))

    # Resident operands never change blocks (constant index_maps); single-buffer
    # them to halve their VMEM footprint when supported.
    resident = dict(pipeline_mode=pl.Buffered(1)) if single_buffer_weights else {}

    out_padded = pl.pallas_call(
        _twolayer_kernel,
        out_shape=jax.ShapeDtypeStruct((B_pad, C_pad), out_dtype),
        grid_spec=pltpu.PrefetchScalarGridSpec(
            num_scalar_prefetch=0,
            grid=(B_pad // tb,),
            in_specs=[
                pl.BlockSpec((tb, D_pad), lambda i: (i, 0)),                  # x tiled
                pl.BlockSpec((D_pad, H_pad), lambda i: (0, 0), **resident),   # w1 resident
                pl.BlockSpec((1, H_pad), lambda i: (0, 0), **resident),       # b1 resident
                pl.BlockSpec((H_pad, C_pad), lambda i: (0, 0), **resident),   # w2 resident
                pl.BlockSpec((1, C_pad), lambda i: (0, 0), **resident),       # b2 resident
            ],
            out_specs=pl.BlockSpec((tb, C_pad), lambda i: (i, 0)),
        ),
        compiler_params=pltpu.CompilerParams(
            # Batch tiles are independent -> shard across v7x's 2 TCs; free on
            # single-TC v5e/v6e.
            dimension_semantics=("parallel",),
            vmem_limit_bytes=_VMEM_LIMIT_BYTES,
        ),
    )(x2d, w1p, b1p, w2p, b2p)

    return out_padded[:B, :num_classes]


_BUFFERED_ONE_OK = True   # flipped off if this build rejects pl.Buffered(1) here


def two_layer_net(x_nchw, params: TwoLayerParams, *, tile_b=1024,
                  out_dtype=jnp.float32):
    """Forward pass matching TwoLayerNet.forward; returns (B, num_classes)."""
    global _BUFFERED_ONE_OK
    w1p, b1p, w2p, b2p, input_dim, num_classes = params
    B = x_nchw.shape[0]
    D_pad = w1p.shape[0]
    C_pad = w2p.shape[1]
    assert int(jnp.prod(jnp.array(x_nchw.shape[1:]))) == input_dim, \
        "input feature dim mismatch"

    # Pessimistic (double-buffered) resident weight footprint for the budget.
    resident_bytes = 2 * sum(a.size * a.dtype.itemsize for a in (w1p, b1p, w2p, b2p))
    out_itemsize = jnp.dtype(out_dtype).itemsize
    tb = _choose_tile_b(B, D_pad, C_pad, x_nchw.dtype.itemsize, out_itemsize,
                        resident_bytes, tile_b)

    kwargs = dict(tb=tb, num_classes=num_classes, out_dtype=jnp.dtype(out_dtype))
    if _BUFFERED_ONE_OK:
        try:
            return _forward(x_nchw, w1p, b1p, w2p, b2p,
                            single_buffer_weights=True, **kwargs)
        except Exception:
            # pl.Buffered(1) (single-buffered resident blocks) unsupported in
            # this jax/libtpu build -> fall back to default double-buffering.
            _BUFFERED_ONE_OK = False
    return _forward(x_nchw, w1p, b1p, w2p, b2p,
                    single_buffer_weights=False, **kwargs)


def init_params(key, input_dim, hidden_size, num_classes):
    """Deterministic init mimicking PyTorch nn.Linear defaults:
    U(-1/sqrt(fan_in), 1/sqrt(fan_in)) for both weight and bias.
    Weights stored as (in, out) (transposed vs. torch's (out, in))."""
    k1, k2, k3, k4 = jax.random.split(key, 4)
    bound1 = 1.0 / jnp.sqrt(jnp.float32(input_dim))
    bound2 = 1.0 / jnp.sqrt(jnp.float32(hidden_size))
    w1 = jax.random.uniform(k1, (input_dim, hidden_size), jnp.float32,
                            minval=-bound1, maxval=bound1)
    b1 = jax.random.uniform(k2, (hidden_size,), jnp.float32,
                            minval=-bound1, maxval=bound1)
    w2 = jax.random.uniform(k3, (hidden_size, num_classes), jnp.float32,
                            minval=-bound2, maxval=bound2)
    b2 = jax.random.uniform(k4, (num_classes,), jnp.float32,
                            minval=-bound2, maxval=bound2)
    return w1, b1, w2, b2


if __name__ == "__main__":
    key = jax.random.PRNGKey(0)
    kx, kp = jax.random.split(key)

    # Small shapes consistent with the module's forward:
    # x: (B=2, C=4, H=16, W=16) -> input_dim = 4*16*16 = 1024
    B, Cch, Himg, Wimg = 2, 4, 16, 16
    input_dim = Cch * Himg * Wimg
    hidden_size = 32
    num_classes = 10

    x = jax.random.normal(kx, (B, Cch, Himg, Wimg), dtype=jnp.float32)
    w1, b1, w2, b2 = init_params(kp, input_dim, hidden_size, num_classes)
    params = prepare_params(w1, b1, w2, b2)   # one-time pad + bf16 cast

    out = two_layer_net(x, params)
    out = jax.block_until_ready(out)

    # Pure-JAX reference with matching bf16 MXU operands / f32 accumulation.
    xb = x.reshape(B, -1).astype(jnp.bfloat16)
    h_ref = jnp.dot(xb, w1.astype(jnp.bfloat16),
                    preferred_element_type=jnp.float32) + b1
    s_ref = jax.nn.sigmoid(h_ref)
    ref = jnp.dot(s_ref.astype(jnp.bfloat16), w2.astype(jnp.bfloat16),
                  preferred_element_type=jnp.float32) + b2

    assert out.shape == (B, num_classes)
    assert jnp.allclose(out, ref, atol=2e-3, rtol=2e-3), (
        f"max abs err {jnp.max(jnp.abs(out - ref))}")

    print("KERNEL_OK")
</pallas_src>

<mosaic_0001>
module attributes {stable_mosaic.version = 11 : i64} {
  func.func @_twolayer_kernel(%arg0: i32, %arg1: memref<8x1024xf32, #tpu.memory_space<vmem>>, %arg2: memref<1024x128xbf16, #tpu.memory_space<vmem>>, %arg3: memref<1x128xf32, #tpu.memory_space<vmem>>, %arg4: memref<128x128xbf16, #tpu.memory_space<vmem>>, %arg5: memref<1x128xf32, #tpu.memory_space<vmem>>, %arg6: memref<8x128xf32, #tpu.memory_space<vmem>>) attributes {dimension_semantics = [#tpu.dimension_semantics<parallel>], iteration_bounds = array<i64: 1>, scalar_prefetch = 0 : i64, scratch_operands = 0 : i64, tpu.core_type = #tpu.core_type<tc>, window_params = [{transform_indices = @transform_0, window_bounds = array<i64: 8, 1024>}, {pipeline_mode = #tpu.pipeline_mode<synchronous>, transform_indices = @transform_1, window_bounds = array<i64: 1024, 128>}, {pipeline_mode = #tpu.pipeline_mode<synchronous>, transform_indices = @transform_2, window_bounds = array<i64: 1, 128>}, {pipeline_mode = #tpu.pipeline_mode<synchronous>, transform_indices = @transform_3, window_bounds = array<i64: 128, 128>}, {pipeline_mode = #tpu.pipeline_mode<synchronous>, transform_indices = @transform_4, window_bounds = array<i64: 1, 128>}, {transform_indices = @transform_5, window_bounds = array<i64: 8, 128>}]} {
    %c0 = arith.constant 0 : index
    %c0_0 = arith.constant 0 : index
    %0 = vector.load %arg1[%c0, %c0_0] : memref<8x1024xf32, #tpu.memory_space<vmem>>, vector<8x1024xf32>
    %1 = arith.truncf %0 : vector<8x1024xf32> to vector<8x1024xbf16>
    %c0_1 = arith.constant 0 : index
    %c0_2 = arith.constant 0 : index
    %2 = vector.load %arg2[%c0_1, %c0_2] : memref<1024x128xbf16, #tpu.memory_space<vmem>>, vector<1024x128xbf16>
    %cst = arith.constant dense<0.000000e+00> : vector<8x128xf32>
    %3 = tpu.matmul %1, %2, %cst {dimension_numbers = #tpu.dot_dimension_numbers<[1], [0], [0], [1], [0, 0, 1, 1], [], []>} : vector<8x1024xbf16>, vector<1024x128xbf16>, vector<8x128xf32> -> vector<8x128xf32>
    %c0_3 = arith.constant 0 : index
    %c0_4 = arith.constant 0 : index
    %4 = vector.load %arg3[%c0_3, %c0_4] : memref<1x128xf32, #tpu.memory_space<vmem>>, vector<1x128xf32>
    %5 = vector.broadcast %4 : vector<1x128xf32> to vector<8x128xf32>
    %6 = arith.addf %3, %5 : vector<8x128xf32>
    %7 = arith.negf %6 : vector<8x128xf32>
    %8 = math.exp %7 : vector<8x128xf32>
    %cst_5 = arith.constant 1.000000e+00 : f32
    %9 = vector.broadcast %cst_5 : f32 to vector<8x128xf32>
    %10 = arith.addf %9, %8 : vector<8x128xf32>
    %11 = arith.divf %9, %10 : vector<8x128xf32>
    %12 = arith.truncf %11 : vector<8x128xf32> to vector<8x128xbf16>
    %c0_6 = arith.constant 0 : index
    %c0_7 = arith.constant 0 : index
    %13 = vector.load %arg4[%c0_6, %c0_7] : memref<128x128xbf16, #tpu.memory_space<vmem>>, vector<128x128xbf16>
    %cst_8 = arith.constant dense<0.000000e+00> : vector<8x128xf32>
    %14 = tpu.matmul %12, %13, %cst_8 {dimension_numbers = #tpu.dot_dimension_numbers<[1], [0], [0], [1], [0, 0, 1, 1], [], []>} : vector<8x128xbf16>, vector<128x128xbf16>, vector<8x128xf32> -> vector<8x128xf32>
    %c0_9 = arith.constant 0 : index
    %c0_10 = arith.constant 0 : index
    %15 = vector.load %arg5[%c0_9, %c0_10] : memref<1x128xf32, #tpu.memory_space<vmem>>, vector<1x128xf32>
    %16 = vector.broadcast %15 : vector<1x128xf32> to vector<8x128xf32>
    %17 = arith.addf %14, %16 : vector<8x128xf32>
    %c0_11 = arith.constant 0 : index
    %c0_12 = arith.constant 0 : index
    %18 = vector.load %arg6[%c0_11, %c0_12] : memref<8x128xf32, #tpu.memory_space<vmem>>, vector<8x128xf32>
    tpu.vector_store %arg6[%c0_11, %c0_12], %17 {strides = array<i32>} : memref<8x128xf32, #tpu.memory_space<vmem>>, vector<8x128xf32>,
    return
  }
  func.func @transform_0(%arg0: i32) -> (i32, i32) {
    %c0_i32 = arith.constant 0 : i32
    %c0_i32_0 = arith.constant 0 : i32
    return %arg0, %c0_i32 : i32, i32
  }
  func.func @transform_1(%arg0: i32) -> (i32, i32) {
    %c0_i32 = arith.constant 0 : i32
    %c0_i32_0 = arith.constant 0 : i32
    %c0_i32_1 = arith.constant 0 : i32
    return %c0_i32, %c0_i32_0 : i32, i32
  }
  func.func @transform_2(%arg0: i32) -> (i32, i32) {
    %c0_i32 = arith.constant 0 : i32
    %c0_i32_0 = arith.constant 0 : i32
    %c0_i32_1 = arith.constant 0 : i32
    return %c0_i32, %c0_i32_0 : i32, i32
  }
  func.func @transform_3(%arg0: i32) -> (i32, i32) {
    %c0_i32 = arith.constant 0 : i32
    %c0_i32_0 = arith.constant 0 : i32
    %c0_i32_1 = arith.constant 0 : i32
    return %c0_i32, %c0_i32_0 : i32, i32
  }
  func.func @transform_4(%arg0: i32) -> (i32, i32) {
    %c0_i32 = arith.constant 0 : i32
    %c0_i32_0 = arith.constant 0 : i32
    %c0_i32_1 = arith.constant 0 : i32
    return %c0_i32, %c0_i32_0 : i32, i32
  }
  func.func @transform_5(%arg0: i32) -> (i32, i32) {
    %c0_i32 = arith.constant 0 : i32
    %c0_i32_0 = arith.constant 0 : i32
    return %arg0, %c0_i32 : i32, i32
  }
}

module attributes {stable_mosaic.version = 11 : i64} {
  func.func @_twolayer_kernel(%arg0: i32, %arg1: memref<8x1024xf32, #tpu.memory_space<vmem>>, %arg2: memref<1024x128xbf16, #tpu.memory_space<vmem>>, %arg3: memref<1x128xf32, #tpu.memory_space<vmem>>, %arg4: memref<128x128xbf16, #tpu.memory_space<vmem>>, %arg5: memref<1x128xf32, #tpu.memory_space<vmem>>, %arg6: memref<8x128xf32, #tpu.memory_space<vmem>>) attributes {dimension_semantics = [#tpu.dimension_semantics<parallel>], iteration_bounds = array<i64: 1>, scalar_prefetch = 0 : i64, scratch_operands = 0 : i64, tpu.core_type = #tpu.core_type<tc>, window_params = [{transform_indices = @transform_0, window_bounds = array<i64: 8, 1024>}, {pipeline_mode = #tpu.pipeline_mode<synchronous>, transform_indices = @transform_1, window_bounds = array<i64: 1024, 128>}, {pipeline_mode = #tpu.pipeline_mode<synchronous>, transform_indices = @transform_2, window_bounds = array<i64: 1, 128>}, {pipeline_mode = #tpu.pipeline_mode<synchronous>, transform_indices = @transform_3, window_bounds = array<i64: 128, 128>}, {pipeline_mode = #tpu.pipeline_mode<synchronous>, transform_indices = @transform_4, window_bounds = array<i64: 1, 128>}, {transform_indices = @transform_5, window_bounds = array<i64: 8, 128>}]} {
    %c0 = arith.constant 0 : index
    %c0_0 = arith.constant 0 : index
    %0 = vector.load %arg1[%c0, %c0_0] : memref<8x1024xf32, #tpu.memory_space<vmem>>, vector<8x1024xf32>
    %1 = arith.truncf %0 : vector<8x1024xf32> to vector<8x1024xbf16>
    %c0_1 = arith.constant 0 : index
    %c0_2 = arith.constant 0 : index
    %2 = vector.load %arg2[%c0_1, %c0_2] : memref<1024x128xbf16, #tpu.memory_space<vmem>>, vector<1024x128xbf16>
    %cst = arith.constant dense<0.000000e+00> : vector<8x128xf32>
    %3 = tpu.matmul %1, %2, %cst {dimension_numbers = #tpu.dot_dimension_numbers<[1], [0], [0], [1], [0, 0, 1, 1], [], []>} : vector<8x1024xbf16>, vector<1024x128xbf16>, vector<8x128xf32> -> vector<8x128xf32>
    %c0_3 = arith.constant 0 : index
    %c0_4 = arith.constant 0 : index
    %4 = vector.load %arg3[%c0_3, %c0_4] : memref<1x128xf32, #tpu.memory_space<vmem>>, vector<1x128xf32>
    %5 = vector.broadcast %4 : vector<1x128xf32> to vector<8x128xf32>
    %6 = arith.addf %3, %5 : vector<8x128xf32>
    %7 = arith.negf %6 : vector<8x128xf32>
    %8 = math.exp %7 : vector<8x128xf32>
    %cst_5 = arith.constant 1.000000e+00 : f32
    %9 = vector.broadcast %cst_5 : f32 to vector<8x128xf32>
    %10 = arith.addf %9, %8 : vector<8x128xf32>
    %11 = arith.divf %9, %10 : vector<8x128xf32>
    %12 = arith.truncf %11 : vector<8x128xf32> to vector<8x128xbf16>
    %c0_6 = arith.constant 0 : index
    %c0_7 = arith.constant 0 : index
    %13 = vector.load %arg4[%c0_6, %c0_7] : memref<128x128xbf16, #tpu.memory_space<vmem>>, vector<128x128xbf16>
    %cst_8 = arith.constant dense<0.000000e+00> : vector<8x128xf32>
    %14 = tpu.matmul %12, %13, %cst_8 {dimension_numbers = #tpu.dot_dimension_numbers<[1], [0], [0], [1], [0, 0, 1, 1], [], []>} : vector<8x128xbf16>, vector<128x128xbf16>, vector<8x128xf32> -> vector<8x128xf32>
    %c0_9 = arith.constant 0 : index
    %c0_10 = arith.constant 0 : index
    %15 = vector.load %arg5[%c0_9, %c0_10] : memref<1x128xf32, #tpu.memory_space<vmem>>, vector<1x128xf32>
    %16 = vector.broadcast %15 : vector<1x128xf32> to vector<8x128xf32>
    %17 = arith.addf %14, %16 : vector<8x128xf32>
    %c0_11 = arith.constant 0 : index
    %c0_12 = arith.constant 0 : index
    %18 = vector.load %arg6[%c0_11, %c0_12] : memref<8x128xf32, #tpu.memory_space<vmem>>, vector<8x128xf32>
    tpu.vector_store %arg6[%c0_11, %c0_12], %17 {strides = array<i32>} : memref<8x128xf32, #tpu.memory_space<vmem>>, vector<8x128xf32>,
    return
  }
  func.func @transform_0(%arg0: i32) -> (i32, i32) {
    %c0_i32 = arith.constant 0 : i32
    %c0_i32_0 = arith.constant 0 : i32
    return %arg0, %c0_i32 : i32, i32
  }
  func.func @transform_1(%arg0: i32) -> (i32, i32) {
    %c0_i32 = arith.constant 0 : i32
    %c0_i32_0 = arith.constant 0 : i32
    %c0_i32_1 = arith.constant 0 : i32
    return %c0_i32, %c0_i32_0 : i32, i32
  }
  func.func @transform_2(%arg0: i32) -> (i32, i32) {
    %c0_i32 = arith.constant 0 : i32
    %c0_i32_0 = arith.constant 0 : i32
    %c0_i32_1 = arith.constant 0 : i32
    return %c0_i32, %c0_i32_0 : i32, i32
  }
  func.func @transform_3(%arg0: i32) -> (i32, i32) {
    %c0_i32 = arith.constant 0 : i32
    %c0_i32_0 = arith.constant 0 : i32
    %c0_i32_1 = arith.constant 0 : i32
    return %c0_i32, %c0_i32_0 : i32, i32
  }
  func.func @transform_4(%arg0: i32) -> (i32, i32) {
    %c0_i32 = arith.constant 0 : i32
    %c0_i32_0 = arith.constant 0 : i32
    %c0_i32_1 = arith.constant 0 : i32
    return %c0_i32, %c0_i32_0 : i32, i32
  }
  func.func @transform_5(%arg0: i32) -> (i32, i32) {
    %c0_i32 = arith.constant 0 : i32
    %c0_i32_0 = arith.constant 0 : i32
    return %arg0, %c0_i32 : i32, i32
  }
}

</mosaic_0001>

<bundles_post_ra>
// kernel: _forward.1
= control target key start
LH: loop header
LB: loop body
LE: loop exit
PB: predicated region body
PF: predicated region fallthrough
CT: control target
= control target key end

     0   :  { %10 = vsyncpa [#allocation3], 0  ;;  %s1151_s18 = smov [#allocation2]   ;;  %s1255_s0 = inlined_call_operand.vmem [shape: f32[8,1024], index: 0, kind: input, shape index: {}]   ;;  %s1256_s1 = inlined_call_operand.hbm [shape: bf16[1024,128], index: 1, kind: input, shape index: {}]   ;;  %s1257_s2 = inlined_call_operand.vmem [shape: f32[1,128], index: 2, kind: input, shape index: {}]   ;;  %s1258_s3 = inlined_call_operand.vmem [shape: bf16[128,128], index: 3, kind: input, shape index: {}]   ;;  %s1259_s4 = inlined_call_operand.vmem [shape: f32[1,128], index: 4, kind: input, shape index: {}]   ;;  %s1260_s5 = inlined_call_operand.vmem [shape: f32[8,128], index: 5, kind: output, shape index: {}]  }
   0x1   :  { %s18_s19 = sshll.u32 %s1151_s18, 4  ;;  %s1127_s22 = scalar_lea.hbm %s1256_s1, 8192  ;;  %s19_s19 = int_to_ptr.vmem [resolvable:$true] %s18_s19 }
   0x2   :  { %p1128_p0 = scmp.ne.s32.totalorder %s1256_s1, %s1127_s22  ;;  %p1131_p1 = scmp.lt.u32.totalorder %s1127_s22, %s1256_s1 }
   0x4   :  { %p1133_p2 = pnand %p1131_p1, %p1128_p0 }
   0x6   :  { %1136 = shalt.err (!%p1133_p2)
}
   0x7   :  { %s1137_s27 = scalar_lea.vmem %s19_s19, 8192  ;;  %p1142_p4 = scmp.lt.s32.totalorder %s19_s19, %s19_s19 }
   0x8   :  { %p1138_p3 = scmp.ne.s32.totalorder %s19_s19, %s1137_s27  ;;  %p1143_p5 = scmp.lt.s32.totalorder %s1137_s27, %s1137_s27 }
   0xa   :  { %p1144_p6 = por %p1143_p5, %p1142_p4 }
   0xc   :  { %p1145_p7 = pnand %p1144_p6, %p1138_p3 }
   0xe   :  { %1148 = shalt.err (!%p1145_p7)
}
   0xf   :  { %s1152_s28 = smov 64   ;;  %s1153_s29 = smov 4  }
  0x10   :  { %24 = dma.hbm_to_vmem [thread:$0]  %s1256_s1, 8192, %s19_s19, [#allocation3], %s1152_s28, %s1152_s28, %s1153_s29  }
  0x11   :  { %1149 = dma.done.wait [#allocation3], 8192  }
  0x12   :  { %1150 = vsyncadd [#allocation3], 4294959104  ;;  %v1051_v0 = vld [vmem:[#allocation2 + $0x40] sm:$0xff]   ;;  %v1055_v4 = vld [vmem:[#allocation2 + $0x48] sm:$0xff]   ;;  %vm1155_vm0 = vmmov 0  }
  0x13   :  { %v1052_v1 = vld [vmem:[#allocation2 + $0xc0] sm:$0xff]   ;;  %929 = vmatprep.subr.bf16.mxu0 %v1051_v0  ;;  %v1056_v5 = vld [vmem:[#allocation2 + $0xc8] sm:$0xff]   ;;  %v1059_v8 = vld [vmem:[#allocation2 + $0x50] sm:$0xff]  }
  0x14   :  { %v1053_v2 = vld [vmem:[#allocation2] sm:$0xff]   ;;  %951 = vmatprep.subr.bf16.mxu1 %v1052_v1  ;;  %v1057_v6 = vld [vmem:[#allocation2 + $0x8] sm:$0xff]   ;;  %v1060_v9 = vld [vmem:[#allocation2 + $0xd0] sm:$0xff]  }
  0x15   :  { %v1054_v3 = vld [vmem:[#allocation2 + $0x80] sm:$0xff]   ;;  %930 = vmatpush3.bf16.msra.mxu0 %v1053_v2  ;;  %v1058_v7 = vld [vmem:[#allocation2 + $0x88] sm:$0xff]   ;;  %v1061_v10 = vld [vmem:[#allocation2 + $0x10] sm:$0xff]  }
  0x16   :  { %952 = vmatpush3.bf16.msra.mxu1 %v1054_v3  ;;  %931 = vmatprep.subr.bf16.mxu0 %v1055_v4  ;;  %v1062_v11 = vld [vmem:[#allocation2 + $0x90] sm:$0xff]   ;;  %v1063_v12 = vld [vmem:[#allocation2 + $0x58] sm:$0xff]   ;;  %v1067_v16 = vld [vmem:[#allocation2 + $0x60] sm:$0xff]  }
  0x17   :  { %953 = vmatprep.subr.bf16.mxu1 %v1056_v5  ;;  %v1064_v13 = vld [vmem:[#allocation2 + $0xd8] sm:$0xff]   ;;  %v1068_v17 = vld [vmem:[#allocation2 + $0xe0] sm:$0xff]   ;;  %v1071_v20 = vld [vmem:[#allocation2 + $0x68] sm:$0xff]  }
  0x18   :  { %v1065_v14 = vld [vmem:[#allocation2 + $0x18] sm:$0xff]   ;;  %v1069_v18 = vld [vmem:[#allocation2 + $0x20] sm:$0xff]   ;;  %v1072_v21 = vld [vmem:[#allocation2 + $0xe8] sm:$0xff]  }
  0x19   :  { %932 = vmatpush3.bf16.msra.mxu0 %v1057_v6  ;;  %v1066_v15 = vld [vmem:[#allocation2 + $0x98] sm:$0xff]   ;;  %v1070_v19 = vld [vmem:[#allocation2 + $0xa0] sm:$0xff]   ;;  %v1073_v22 = vld [vmem:[#allocation2 + $0x28] sm:$0xff]  }
  0x1a   :  { %954 = vmatpush3.bf16.msra.mxu1 %v1058_v7  ;;  %933 = vmatprep.subr.bf16.mxu0 %v1059_v8  ;;  %v1074_v23 = vld [vmem:[#allocation2 + $0xa8] sm:$0xff]   ;;  %v1075_v24 = vld [vmem:[#allocation2 + $0x70] sm:$0xff]   ;;  %v1079_v28 = vld [vmem:[#allocation2 + $0x78] sm:$0xff]  }
  0x1b   :  { %955 = vmatprep.subr.bf16.mxu1 %v1060_v9  ;;  %v1076_v25 = vld [vmem:[#allocation2 + $0xf0] sm:$0xff]   ;;  %v1080_v29 = vld [vmem:[#allocation2 + $0xf8] sm:$0xff]   ;;  %v36_v32 = vld [vmem:[%s1255_s0 + $0x8] sm:$0xff] }
  0x1c   :  { %v1077_v26 = vld [vmem:[#allocation2 + $0x30] sm:$0xff]   ;;  %v1081_v30 = vld [vmem:[#allocation2 + $0x38] sm:$0xff]   ;;  %v35_v34 = vld [vmem:[%s1255_s0] sm:$0xff]  ;;  %v44_v35 = vpack.c.bf16 %v36_v32, %v36_v32 }
  0x1d   :  { %934 = vmatpush3.bf16.msra.mxu0 %v1061_v10  ;;  %v1078_v27 = vld [vmem:[#allocation2 + $0xb0] sm:$0xff]   ;;  %v1082_v31 = vld [vmem:[#allocation2 + $0xb8] sm:$0xff]   ;;  %v43_v37 = vpack.c.bf16 %v35_v34, %v35_v34  ;;  %v1083_v40 = vld [vmem:[#allocation2 + $0x140] sm:$0xff]  }
  0x1e   :  { %956 = vmatpush3.bf16.msra.mxu1 %v1062_v11  ;;  %935 = vmatprep.subr.bf16.mxu0 %v1063_v12  ;;  %v38_v33 = vld [vmem:[%s1255_s0 + $0x18] sm:$0xff]  ;;  %v37_v38 = vld [vmem:[%s1255_s0 + $0x10] sm:$0xff]  ;;  %v1084_v41 = vld [vmem:[#allocation2 + $0x1c0] sm:$0xff]  }
  0x1f   :  { %957 = vmatprep.subr.bf16.mxu1 %v1064_v13  ;;  %v46_v36 = vpack.c.bf16 %v38_v33, %v38_v33  ;;  %v45_v39 = vpack.c.bf16 %v37_v38, %v37_v38  ;;  %602 = vmatprep.mubr.bf16.mxu0 %v44_v35  ;;  %v1085_v42 = vld [vmem:[#allocation2 + $0x100] sm:$0xff]   ;;  %v1087_v44 = vld [vmem:[#allocation2 + $0x148] sm:$0xff]   ;;  %v1091_v48 = vld [vmem:[#allocation2 + $0x150] sm:$0xff]  }
  0x20   :  { %v1086_v43 = vld [vmem:[#allocation2 + $0x180] sm:$0xff]   ;;  %v1088_v45 = vld [vmem:[#allocation2 + $0x1c8] sm:$0xff]   ;;  %v1092_v49 = vld [vmem:[#allocation2 + $0x1d0] sm:$0xff]  }
  0x21   :  { %936 = vmatpush3.bf16.msra.mxu0 %v1065_v14  ;;  %642 = vmatprep.mubr.bf16.mxu1 %v46_v36  ;;  %v1089_v46 = vld [vmem:[#allocation2 + $0x108] sm:$0xff]   ;;  %v1093_v50 = vld [vmem:[#allocation2 + $0x110] sm:$0xff]   ;;  %v1095_v52 = vld [vmem:[#allocation2 + $0x158] sm:$0xff]  }
  0x22   :  { %958 = vmatpush3.bf16.msra.mxu1 %v1066_v15  ;;  %937 = vmatprep.subr.bf16.mxu0 %v1067_v16  ;;  %v1090_v47 = vld [vmem:[#allocation2 + $0x188] sm:$0xff]   ;;  %v1094_v51 = vld [vmem:[#allocation2 + $0x190] sm:$0xff]   ;;  %v1096_v53 = vld [vmem:[#allocation2 + $0x1d8] sm:$0xff]  }
  0x23   :  { %959 = vmatprep.subr.bf16.mxu1 %v1068_v17  ;;  %v1097_v54 = vld [vmem:[#allocation2 + $0x118] sm:$0xff]   ;;  %v1099_v56 = vld [vmem:[#allocation2 + $0x160] sm:$0xff]   ;;  %v1103_v60 = vld [vmem:[#allocation2 + $0x168] sm:$0xff]   ;;  %v1154_v17 = vmov 0.0  }
  0x24   :  { %v1098_v55 = vld [vmem:[#allocation2 + $0x198] sm:$0xff]   ;;  %v1100_v57 = vld [vmem:[#allocation2 + $0x1e0] sm:$0xff]   ;;  %v1104_v61 = vld [vmem:[#allocation2 + $0x1e8] sm:$0xff]  }
  0x25   :  { %938 = vmatpush3.bf16.msra.mxu0 %v1069_v18  ;;  %v1101_v58 = vld [vmem:[#allocation2 + $0x120] sm:$0xff]   ;;  %v1105_v62 = vld [vmem:[#allocation2 + $0x128] sm:$0xff]   ;;  %v1107_v0 = vld [vmem:[#allocation2 + $0x170] sm:$0xff]  }
  0x26   :  { %960 = vmatpush3.bf16.msra.mxu1 %v1070_v19  ;;  %939 = vmatprep.subr.bf16.mxu0 %v1071_v20  ;;  %v1102_v59 = vld [vmem:[#allocation2 + $0x1a0] sm:$0xff]   ;;  %v1106_v63 = vld [vmem:[#allocation2 + $0x1a8] sm:$0xff]   ;;  %v1108_v1 = vld [vmem:[#allocation2 + $0x1f0] sm:$0xff]  }
  0x27   :  { %961 = vmatprep.subr.bf16.mxu1 %v1072_v21  ;;  %v1109_v2 = vld [vmem:[#allocation2 + $0x130] sm:$0xff]   ;;  %v1111_v4 = vld [vmem:[#allocation2 + $0x178] sm:$0xff]   ;;  %v40_v8 = vld [vmem:[%s1255_s0 + $0x28] sm:$0xff] }
  0x28   :  { %v1110_v3 = vld [vmem:[#allocation2 + $0x1b0] sm:$0xff]   ;;  %v1112_v5 = vld [vmem:[#allocation2 + $0x1f8] sm:$0xff]   ;;  %v48_v10 = vpack.c.bf16 %v40_v8, %v40_v8  ;;  %v39_v12 = vld [vmem:[%s1255_s0 + $0x20] sm:$0xff] }
  0x29   :  { %940 = vmatpush3.bf16.msra.mxu0 %v1073_v22  ;;  %v1113_v6 = vld [vmem:[#allocation2 + $0x138] sm:$0xff]   ;;  %v41_v13 = vld [vmem:[%s1255_s0 + $0x30] sm:$0xff]  ;;  %v47_v14 = vpack.c.bf16 %v39_v12, %v39_v12  ;;  %v1115_v16 = vld [vmem:[%s1258_s3] sm:$0xff]  }
  0x2a   :  { %962 = vmatpush3.bf16.msra.mxu1 %v1074_v23  ;;  %941 = vmatprep.subr.bf16.mxu0 %v1075_v24  ;;  %v1114_v7 = vld [vmem:[#allocation2 + $0x1b8] sm:$0xff]   ;;  %v49_v15 = vpack.c.bf16 %v41_v13, %v41_v13  ;;  %v1116_v18 = vld [vmem:[%s1258_s3 + $0x8] sm:$0xff]   ;;  %v1117_v19 = vld [vmem:[%s1258_s3 + $0x10] sm:$0xff]  }
  0x2b   :  { %963 = vmatprep.subr.bf16.mxu1 %v1076_v25  ;;  %v42_v9 = vld [vmem:[%s1255_s0 + $0x38] sm:$0xff]  ;;  %v1119_v21 = vld [vmem:[%s1258_s3 + $0x20] sm:$0xff]   ;;  %v1120_v22 = vld [vmem:[%s1258_s3 + $0x28] sm:$0xff]  }
  0x2c   :  { %v50_v11 = vpack.c.bf16 %v42_v9, %v42_v9  ;;  %v1118_v20 = vld [vmem:[%s1258_s3 + $0x18] sm:$0xff]   ;;  %v1121_v23 = vld [vmem:[%s1258_s3 + $0x30] sm:$0xff]  }
  0x2d   :  { %942 = vmatpush3.bf16.msra.mxu0 %v1077_v26  ;;  %v1122_v24 = vld [vmem:[%s1258_s3 + $0x38] sm:$0xff]  }
  0x2e   :  { %964 = vmatpush3.bf16.msra.mxu1 %v1078_v27  ;;  %943 = vmatprep.subr.bf16.mxu0 %v1079_v28  ;;  %v854_v27 = vld [vmem:[%s1257_s2] ss:$0 sm:$0xff] }
  0x2f   :  { %965 = vmatprep.subr.bf16.mxu1 %v1080_v29 }
  0x31   :  { %944 = vmatpush3.bf16.msra.mxu0 %v1081_v30 }
  0x32   :  { %966 = vmatpush3.bf16.msra.mxu1 %v1082_v31  ;;  %973 = vmatprep.subr.bf16.mxu0 %v1083_v40 }
  0x33   :  { %995 = vmatprep.subr.bf16.mxu1 %v1084_v41 }
  0x34   :  { %603 = vmatmul.mubr.bf16.vlgmr.msra.gmra.mrb[0].mxu0 %v43_v37 }
  0x35   :  { %643 = vmatmul.mubr.bf16.vlgmr.msra.gmra.mrb[0].mxu1 %v45_v39  ;;  %974 = vmatpush3.bf16.msra.mxu0 %v1085_v42 }
  0x36   :  { %996 = vmatpush3.bf16.msra.mxu1 %v1086_v43  ;;  %975 = vmatprep.subr.bf16.mxu0 %v1087_v44 }
  0x37   :  { %997 = vmatprep.subr.bf16.mxu1 %v1088_v45  ;;  %682 = vmatprep.mubr.bf16.mxu0 %v48_v10 }
  0x38   :  { %722 = vmatprep.mubr.bf16.mxu1 %v50_v11 }
  0x39   :  { %976 = vmatpush3.bf16.msra.mxu0 %v1089_v46 }
  0x3a   :  { %998 = vmatpush3.bf16.msra.mxu1 %v1090_v47  ;;  %977 = vmatprep.subr.bf16.mxu0 %v1091_v48 }
  0x3b   :  { %999 = vmatprep.subr.bf16.mxu1 %v1092_v49 }
  0x3d   :  { %978 = vmatpush3.bf16.msra.mxu0 %v1093_v50 }
  0x3e   :  { %1000 = vmatpush3.bf16.msra.mxu1 %v1094_v51  ;;  %979 = vmatprep.subr.bf16.mxu0 %v1095_v52 }
  0x3f   :  { %1001 = vmatprep.subr.bf16.mxu1 %v1096_v53 }
  0x41   :  { %980 = vmatpush3.bf16.msra.mxu0 %v1097_v54 }
  0x42   :  { %1002 = vmatpush3.bf16.msra.mxu1 %v1098_v55  ;;  %981 = vmatprep.subr.bf16.mxu0 %v1099_v56  ;;  %v920_v55 = vld [vmem:[%s1259_s4] ss:$0 sm:$0xff] }
  0x43   :  { %1003 = vmatprep.subr.bf16.mxu1 %v1100_v57 }
  0x45   :  { %982 = vmatpush3.bf16.msra.mxu0 %v1101_v58 }
  0x46   :  { %1004 = vmatpush3.bf16.msra.mxu1 %v1102_v59  ;;  %983 = vmatprep.subr.bf16.mxu0 %v1103_v60 }
  0x47   :  { %1005 = vmatprep.subr.bf16.mxu1 %v1104_v61 }
  0x49   :  { %984 = vmatpush3.bf16.msra.mxu0 %v1105_v62 }
  0x4a   :  { %1006 = vmatpush3.bf16.msra.mxu1 %v1106_v63  ;;  %985 = vmatprep.subr.bf16.mxu0 %v1107_v0 }
  0x4b   :  { %1007 = vmatprep.subr.bf16.mxu1 %v1108_v1 }
  0x4d   :  { %986 = vmatpush3.bf16.msra.mxu0 %v1109_v2 }
  0x4e   :  { %1008 = vmatpush3.bf16.msra.mxu1 %v1110_v3  ;;  %987 = vmatprep.subr.bf16.mxu0 %v1111_v4 }
  0x4f   :  { %1009 = vmatprep.subr.bf16.mxu1 %v1112_v5 }
  0x51   :  { %988 = vmatpush3.bf16.msra.mxu0 %v1113_v6 }
  0x52   :  { %1010 = vmatpush3.bf16.msra.mxu1 %v1114_v7  ;;  %1026 = vmatprep.subr.bf16.mxu0 %v1154_v17 }
  0x54   :  { %683 = vmatmul.mubr.bf16.vlgmr.msra.gmra.mrb[4].mxu0 %v47_v14 }
  0x55   :  { %723 = vmatmul.mubr.bf16.vlgmr.msra.gmra.mrb[4].mxu1 %v49_v15  ;;  %1027 = vmatpush3.bf16.msra.mxu0 %v1115_v16 }
  0x56   :  { %1028 = vmatprep.subr.bf16.mxu0 %v1154_v17  ;;  %1042 = vmatprep.mubr.msk.bf16.mxu0 %vm1155_vm0, %v1154_v17 }
  0x59   :  { %1029 = vmatpush3.bf16.msra.mxu0 %v1116_v18 }
  0x5a   :  { %1030 = vmatprep.subr.bf16.mxu0 %v1154_v17 }
  0x5d   :  { %1031 = vmatpush3.bf16.msra.mxu0 %v1117_v19 }
  0x5e   :  { %1032 = vmatprep.subr.bf16.mxu0 %v1154_v17 }
  0x61   :  { %1033 = vmatpush3.bf16.msra.mxu0 %v1118_v20 }
  0x62   :  { %1034 = vmatprep.subr.bf16.mxu0 %v1154_v17 }
  0x65   :  { %1035 = vmatpush3.bf16.msra.mxu0 %v1119_v21 }
  0x66   :  { %1036 = vmatprep.subr.bf16.mxu0 %v1154_v17 }
  0x69   :  { %1037 = vmatpush3.bf16.msra.mxu0 %v1120_v22 }
  0x6a   :  { %1038 = vmatprep.subr.bf16.mxu0 %v1154_v17 }
  0x6d   :  { %1039 = vmatpush3.bf16.msra.mxu0 %v1121_v23 }
  0x6e   :  { %1040 = vmatprep.subr.bf16.mxu0 %v1154_v17 }
  0x71   :  { %1041 = vmatpush3.bf16.msra.mxu0 %v1122_v24 }
 0x107   :  { %v945_v25 = vpop.f32.mrb[0].mxu0 }
 0x108   :  { %v967_v26 = vpop.f32.mrb[0].mxu1  ;;  %v946_v28 = vpop.f32.mrb[1].mxu0 }
 0x109   :  { %v968_v29 = vpop.f32.mrb[1].mxu1  ;;  %v947_v30 = vadd.f32 %v946_v28, %v945_v25  ;;  %v948_v32 = vpop.f32.mrb[2].mxu0 }
 0x10a   :  { %v969_v31 = vadd.f32 %v968_v29, %v967_v26  ;;  %v970_v33 = vpop.f32.mrb[2].mxu1  ;;  %v949_v34 = vpop.f32.mrb[3].mxu0 }
 0x10b   :  { %v971_v35 = vpop.f32.mrb[3].mxu1  ;;  %v605_v36 = vadd.f32 %v947_v30, %v854_v27 }
 0x10d   :  { %v645_v37 = vadd.f32 %v969_v31, %v605_v36 }
 0x127   :  { %v989_v38 = vpop.f32.mrb[4].mxu0 }
 0x128   :  { %v1011_v39 = vpop.f32.mrb[4].mxu1  ;;  %v990_v40 = vpop.f32.mrb[5].mxu0 }
 0x129   :  { %v991_v41 = vadd.f32 %v990_v40, %v989_v38  ;;  %v1012_v42 = vpop.f32.mrb[5].mxu1  ;;  %v992_v43 = vpop.f32.mrb[6].mxu0 }
 0x12a   :  { %v1013_v44 = vadd.f32 %v1012_v42, %v1011_v39  ;;  %v1014_v45 = vpop.f32.mrb[6].mxu1  ;;  %v993_v46 = vpop.f32.mrb[7].mxu0 }
 0x12b   :  { %v685_v47 = vadd.f32 %v991_v41, %v645_v37  ;;  %v1015_v48 = vpop.f32.mrb[7].mxu1 }
 0x12d   :  { %v725_v49 = vadd.f32 %v1013_v44, %v685_v47 }
 0x12f   :  { %v919_v50 = vmul.f32 -1.442695, %v725_v49 }
 0x131   :  { %1123 = vpow2.f32 %v919_v50 }
 0x13b   :  { %v1124_v51 = vpop.eup %1123 }
 0x13c   :  { %v733_v52 = vadd.f32 1.0, %v1124_v51 }
 0x13e   :  { %1125 = vrcp.f32 %v733_v52 }
 0x148   :  { %v1126_v53 = vpop.eup %1125 }
 0x149   :  { %v736_v54 = vpack.c.bf16 %v1126_v53, %v1126_v53 }
 0x14b   :  { %1043 = vmatmul.mubr.bf16.vlgmr.msra.gmra.mrb[8].mxu0 %v736_v54 }
 0x21e   :  { %v842_v56 = vpop.f32.mrb[8].mxu0 }
 0x21f   :  { %v843_v57 = vadd.f32 %v920_v55, %v842_v56  ;;  %v1044_v58 = vpop.f32.mrb[9].mxu0 }
 0x220   :  { %v845_v59 = vpop.f32.mrb[10].mxu0 }
 0x221   :  { %848 = vst [vmem:[%s1260_s5] sm:$0xff] %v843_v57  ;;  %v1045_v60 = vpop.f32.mrb[11].mxu0 }
 0x222   :  { %853 = vsyncpa [#allocation3], 1 }

// kernel: _forward.1
= control target key start
LH: loop header
LB: loop body
LE: loop exit
PB: predicated region body
PF: predicated region fallthrough
CT: control target
= control target key end

     0   :  { %10 = vsyncpa [#allocation3], 0  ;;  %s1151_s18 = smov [#allocation2]   ;;  %s1255_s0 = inlined_call_operand.vmem [shape: f32[8,1024], index: 0, kind: input, shape index: {}]   ;;  %s1256_s1 = inlined_call_operand.hbm [shape: bf16[1024,128], index: 1, kind: input, shape index: {}]   ;;  %s1257_s2 = inlined_call_operand.vmem [shape: f32[1,128], index: 2, kind: input, shape index: {}]   ;;  %s1258_s3 = inlined_call_operand.vmem [shape: bf16[128,128], index: 3, kind: input, shape index: {}]   ;;  %s1259_s4 = inlined_call_operand.vmem [shape: f32[1,128], index: 4, kind: input, shape index: {}]   ;;  %s1260_s5 = inlined_call_operand.vmem [shape: f32[8,128], index: 5, kind: output, shape index: {}]  }
   0x1   :  { %s18_s19 = sshll.u32 %s1151_s18, 4  ;;  %s1127_s22 = scalar_lea.hbm %s1256_s1, 8192  ;;  %s19_s19 = int_to_ptr.vmem [resolvable:$true] %s18_s19 }
   0x2   :  { %p1128_p0 = scmp.ne.s32.totalorder %s1256_s1, %s1127_s22  ;;  %p1131_p1 = scmp.lt.u32.totalorder %s1127_s22, %s1256_s1 }
   0x4   :  { %p1133_p2 = pnand %p1131_p1, %p1128_p0 }
   0x6   :  { %1136 = shalt.err (!%p1133_p2)
}
   0x7   :  { %s1137_s27 = scalar_lea.vmem %s19_s19, 8192  ;;  %p1142_p4 = scmp.lt.s32.totalorder %s19_s19, %s19_s19 }
   0x8   :  { %p1138_p3 = scmp.ne.s32.totalorder %s19_s19, %s1137_s27  ;;  %p1143_p5 = scmp.lt.s32.totalorder %s1137_s27, %s1137_s27 }
   0xa   :  { %p1144_p6 = por %p1143_p5, %p1142_p4 }
   0xc   :  { %p1145_p7 = pnand %p1144_p6, %p1138_p3 }
   0xe   :  { %1148 = shalt.err (!%p1145_p7)
}
   0xf   :  { %s1152_s28 = smov 64   ;;  %s1153_s29 = smov 4  }
  0x10   :  { %24 = dma.hbm_to_vmem [thread:$0]  %s1256_s1, 8192, %s19_s19, [#allocation3], %s1152_s28, %s1152_s28, %s1153_s29  }
  0x11   :  { %1149 = dma.done.wait [#allocation3], 8192  }
  0x12   :  { %1150 = vsyncadd [#allocation3], 4294959104  ;;  %v1051_v0 = vld [vmem:[#allocation2 + $0x40] sm:$0xff]   ;;  %v1055_v4 = vld [vmem:[#allocation2 + $0x48] sm:$0xff]   ;;  %vm1155_vm0 = vmmov 0  }
  0x13   :  { %v1052_v1 = vld [vmem:[#allocation2 + $0xc0] sm:$0xff]   ;;  %929 = vmatprep.subr.bf16.mxu0 %v1051_v0  ;;  %v1056_v5 = vld [vmem:[#allocation2 + $0xc8] sm:$0xff]   ;;  %v1059_v8 = vld [vmem:[#allocation2 + $0x50] sm:$0xff]  }
  0x14   :  { %v1053_v2 = vld [vmem:[#allocation2] sm:$0xff]   ;;  %951 = vmatprep.subr.bf16.mxu1 %v1052_v1  ;;  %v1057_v6 = vld [vmem:[#allocation2 + $0x8] sm:$0xff]   ;;  %v1060_v9 = vld [vmem:[#allocation2 + $0xd0] sm:$0xff]  }
  0x15   :  { %v1054_v3 = vld [vmem:[#allocation2 + $0x80] sm:$0xff]   ;;  %930 = vmatpush3.bf16.msra.mxu0 %v1053_v2  ;;  %v1058_v7 = vld [vmem:[#allocation2 + $0x88] sm:$0xff]   ;;  %v1061_v10 = vld [vmem:[#allocation2 + $0x10] sm:$0xff]  }
  0x16   :  { %952 = vmatpush3.bf16.msra.mxu1 %v1054_v3  ;;  %931 = vmatprep.subr.bf16.mxu0 %v1055_v4  ;;  %v1062_v11 = vld [vmem:[#allocation2 + $0x90] sm:$0xff]   ;;  %v1063_v12 = vld [vmem:[#allocation2 + $0x58] sm:$0xff]   ;;  %v1067_v16 = vld [vmem:[#allocation2 + $0x60] sm:$0xff]  }
  0x17   :  { %953 = vmatprep.subr.bf16.mxu1 %v1056_v5  ;;  %v1064_v13 = vld [vmem:[#allocation2 + $0xd8] sm:$0xff]   ;;  %v1068_v17 = vld [vmem:[#allocation2 + $0xe0] sm:$0xff]   ;;  %v1071_v20 = vld [vmem:[#allocation2 + $0x68] sm:$0xff]  }
  0x18   :  { %v1065_v14 = vld [vmem:[#allocation2 + $0x18] sm:$0xff]   ;;  %v1069_v18 = vld [vmem:[#allocation2 + $0x20] sm:$0xff]   ;;  %v1072_v21 = vld [vmem:[#allocation2 + $0xe8] sm:$0xff]  }
  0x19   :  { %932 = vmatpush3.bf16.msra.mxu0 %v1057_v6  ;;  %v1066_v15 = vld [vmem:[#allocation2 + $0x98] sm:$0xff]   ;;  %v1070_v19 = vld [vmem:[#allocation2 + $0xa0] sm:$0xff]   ;;  %v1073_v22 = vld [vmem:[#allocation2 + $0x28] sm:$0xff]  }
  0x1a   :  { %954 = vmatpush3.bf16.msra.mxu1 %v1058_v7  ;;  %933 = vmatprep.subr.bf16.mxu0 %v1059_v8  ;;  %v1074_v23 = vld [vmem:[#allocation2 + $0xa8] sm:$0xff]   ;;  %v1075_v24 = vld [vmem:[#allocation2 + $0x70] sm:$0xff]   ;;  %v1079_v28 = vld [vmem:[#allocation2 + $0x78] sm:$0xff]  }
  0x1b   :  { %955 = vmatprep.subr.bf16.mxu1 %v1060_v9  ;;  %v1076_v25 = vld [vmem:[#allocation2 + $0xf0] sm:$0xff]   ;;  %v1080_v29 = vld [vmem:[#allocation2 + $0xf8] sm:$0xff]   ;;  %v36_v32 = vld [vmem:[%s1255_s0 + $0x8] sm:$0xff] }
  0x1c   :  { %v1077_v26 = vld [vmem:[#allocation2 + $0x30] sm:$0xff]   ;;  %v1081_v30 = vld [vmem:[#allocation2 + $0x38] sm:$0xff]   ;;  %v35_v34 = vld [vmem:[%s1255_s0] sm:$0xff]  ;;  %v44_v35 = vpack.c.bf16 %v36_v32, %v36_v32 }
  0x1d   :  { %934 = vmatpush3.bf16.msra.mxu0 %v1061_v10  ;;  %v1078_v27 = vld [vmem:[#allocation2 + $0xb0] sm:$0xff]   ;;  %v1082_v31 = vld [vmem:[#allocation2 + $0xb8] sm:$0xff]   ;;  %v43_v37 = vpack.c.bf16 %v35_v34, %v35_v34  ;;  %v1083_v40 = vld [vmem:[#allocation2 + $0x140] sm:$0xff]  }
  0x1e   :  { %956 = vmatpush3.bf16.msra.mxu1 %v1062_v11  ;;  %935 = vmatprep.subr.bf16.mxu0 %v1063_v12  ;;  %v38_v33 = vld [vmem:[%s1255_s0 + $0x18] sm:$0xff]  ;;  %v37_v38 = vld [vmem:[%s1255_s0 + $0x10] sm:$0xff]  ;;  %v1084_v41 = vld [vmem:[#allocation2 + $0x1c0] sm:$0xff]  }
  0x1f   :  { %957 = vmatprep.subr.bf16.mxu1 %v1064_v13  ;;  %v46_v36 = vpack.c.bf16 %v38_v33, %v38_v33  ;;  %v45_v39 = vpack.c.bf16 %v37_v38, %v37_v38  ;;  %602 = vmatprep.mubr.bf16.mxu0 %v44_v35  ;;  %v1085_v42 = vld [vmem:[#allocation2 + $0x100] sm:$0xff]   ;;  %v1087_v44 = vld [vmem:[#allocation2 + $0x148] sm:$0xff]   ;;  %v1091_v48 = vld [vmem:[#allocation2 + $0x150] sm:$0xff]  }
  0x20   :  { %v1086_v43 = vld [vmem:[#allocation2 + $0x180] sm:$0xff]   ;;  %v1088_v45 = vld [vmem:[#allocation2 + $0x1c8] sm:$0xff]   ;;  %v1092_v49 = vld [vmem:[#allocation2 + $0x1d0] sm:$0xff]  }
  0x21   :  { %936 = vmatpush3.bf16.msra.mxu0 %v1065_v14  ;;  %642 = vmatprep.mubr.bf16.mxu1 %v46_v36  ;;  %v1089_v46 = vld [vmem:[#allocation2 + $0x108] sm:$0xff]   ;;  %v1093_v50 = vld [vmem:[#allocation2 + $0x110] sm:$0xff]   ;;  %v1095_v52 = vld [vmem:[#allocation2 + $0x158] sm:$0xff]  }
  0x22   :  { %958 = vmatpush3.bf16.msra.mxu1 %v1066_v15  ;;  %937 = vmatprep.subr.bf16.mxu0 %v1067_v16  ;;  %v1090_v47 = vld [vmem:[#allocation2 + $0x188] sm:$0xff]   ;;  %v1094_v51 = vld [vmem:[#allocation2 + $0x190] sm:$0xff]   ;;  %v1096_v53 = vld [vmem:[#allocation2 + $0x1d8] sm:$0xff]  }
  0x23   :  { %959 = vmatprep.subr.bf16.mxu1 %v1068_v17  ;;  %v1097_v54 = vld [vmem:[#allocation2 + $0x118] sm:$0xff]   ;;  %v1099_v56 = vld [vmem:[#allocation2 + $0x160] sm:$0xff]   ;;  %v1103_v60 = vld [vmem:[#allocation2 + $0x168] sm:$0xff]   ;;  %v1154_v17 = vmov 0.0  }
  0x24   :  { %v1098_v55 = vld [vmem:[#allocation2 + $0x198] sm:$0xff]   ;;  %v1100_v57 = vld [vmem:[#allocation2 + $0x1e0] sm:$0xff]   ;;  %v1104_v61 = vld [vmem:[#allocation2 + $0x1e8] sm:$0xff]  }
  0x25   :  { %938 = vmatpush3.bf16.msra.mxu0 %v1069_v18  ;;  %v1101_v58 = vld [vmem:[#allocation2 + $0x120] sm:$0xff]   ;;  %v1105_v62 = vld [vmem:[#allocation2 + $0x128] sm:$0xff]   ;;  %v1107_v0 = vld [vmem:[#allocation2 + $0x170] sm:$0xff]  }
  0x26   :  { %960 = vmatpush3.bf16.msra.mxu1 %v1070_v19  ;;  %939 = vmatprep.subr.bf16.mxu0 %v1071_v20  ;;  %v1102_v59 = vld [vmem:[#allocation2 + $0x1a0] sm:$0xff]   ;;  %v1106_v63 = vld [vmem:[#allocation2 + $0x1a8] sm:$0xff]   ;;  %v1108_v1 = vld [vmem:[#allocation2 + $0x1f0] sm:$0xff]  }
  0x27   :  { %961 = vmatprep.subr.bf16.mxu1 %v1072_v21  ;;  %v1109_v2 = vld [vmem:[#allocation2 + $0x130] sm:$0xff]   ;;  %v1111_v4 = vld [vmem:[#allocation2 + $0x178] sm:$0xff]   ;;  %v40_v8 = vld [vmem:[%s1255_s0 + $0x28] sm:$0xff] }
  0x28   :  { %v1110_v3 = vld [vmem:[#allocation2 + $0x1b0] sm:$0xff]   ;;  %v1112_v5 = vld [vmem:[#allocation2 + $0x1f8] sm:$0xff]   ;;  %v48_v10 = vpack.c.bf16 %v40_v8, %v40_v8  ;;  %v39_v12 = vld [vmem:[%s1255_s0 + $0x20] sm:$0xff] }
  0x29   :  { %940 = vmatpush3.bf16.msra.mxu0 %v1073_v22  ;;  %v1113_v6 = vld [vmem:[#allocation2 + $0x138] sm:$0xff]   ;;  %v41_v13 = vld [vmem:[%s1255_s0 + $0x30] sm:$0xff]  ;;  %v47_v14 = vpack.c.bf16 %v39_v12, %v39_v12  ;;  %v1115_v16 = vld [vmem:[%s1258_s3] sm:$0xff]  }
  0x2a   :  { %962 = vmatpush3.bf16.msra.mxu1 %v1074_v23  ;;  %941 = vmatprep.subr.bf16.mxu0 %v1075_v24  ;;  %v1114_v7 = vld [vmem:[#allocation2 + $0x1b8] sm:$0xff]   ;;  %v49_v15 = vpack.c.bf16 %v41_v13, %v41_v13  ;;  %v1116_v18 = vld [vmem:[%s1258_s3 + $0x8] sm:$0xff]   ;;  %v1117_v19 = vld [vmem:[%s1258_s3 + $0x10] sm:$0xff]  }
  0x2b   :  { %963 = vmatprep.subr.bf16.mxu1 %v1076_v25  ;;  %v42_v9 = vld [vmem:[%s1255_s0 + $0x38] sm:$0xff]  ;;  %v1119_v21 = vld [vmem:[%s1258_s3 + $0x20] sm:$0xff]   ;;  %v1120_v22 = vld [vmem:[%s1258_s3 + $0x28] sm:$0xff]  }
  0x2c   :  { %v50_v11 = vpack.c.bf16 %v42_v9, %v42_v9  ;;  %v1118_v20 = vld [vmem:[%s1258_s3 + $0x18] sm:$0xff]   ;;  %v1121_v23 = vld [vmem:[%s1258_s3 + $0x30] sm:$0xff]  }
  0x2d   :  { %942 = vmatpush3.bf16.msra.mxu0 %v1077_v26  ;;  %v1122_v24 = vld [vmem:[%s1258_s3 + $0x38] sm:$0xff]  }
  0x2e   :  { %964 = vmatpush3.bf16.msra.mxu1 %v1078_v27  ;;  %943 = vmatprep.subr.bf16.mxu0 %v1079_v28  ;;  %v854_v27 = vld [vmem:[%s1257_s2] ss:$0 sm:$0xff] }
  0x2f   :  { %965 = vmatprep.subr.bf16.mxu1 %v1080_v29 }
  0x31   :  { %944 = vmatpush3.bf16.msra.mxu0 %v1081_v30 }
  0x32   :  { %966 = vmatpush3.bf16.msra.mxu1 %v1082_v31  ;;  %973 = vmatprep.subr.bf16.mxu0 %v1083_v40 }
  0x33   :  { %995 = vmatprep.subr.bf16.mxu1 %v1084_v41 }
  0x34   :  { %603 = vmatmul.mubr.bf16.vlgmr.msra.gmra.mrb[0].mxu0 %v43_v37 }
  0x35   :  { %643 = vmatmul.mubr.bf16.vlgmr.msra.gmra.mrb[0].mxu1 %v45_v39  ;;  %974 = vmatpush3.bf16.msra.mxu0 %v1085_v42 }
  0x36   :  { %996 = vmatpush3.bf16.msra.mxu1 %v1086_v43  ;;  %975 = vmatprep.subr.bf16.mxu0 %v1087_v44 }
  0x37   :  { %997 = vmatprep.subr.bf16.mxu1 %v1088_v45  ;;  %682 = vmatprep.mubr.bf16.mxu0 %v48_v10 }
  0x38   :  { %722 = vmatprep.mubr.bf16.mxu1 %v50_v11 }
  0x39   :  { %976 = vmatpush3.bf16.msra.mxu0 %v1089_v46 }
  0x3a   :  { %998 = vmatpush3.bf16.msra.mxu1 %v1090_v47  ;;  %977 = vmatprep.subr.bf16.mxu0 %v1091_v48 }
  0x3b   :  { %999 = vmatprep.subr.bf16.mxu1 %v1092_v49 }
  0x3d   :  { %978 = vmatpush3.bf16.msra.mxu0 %v1093_v50 }
  0x3e   :  { %1000 = vmatpush3.bf16.msra.mxu1 %v1094_v51  ;;  %979 = vmatprep.subr.bf16.mxu0 %v1095_v52 }
  0x3f   :  { %1001 = vmatprep.subr.bf16.mxu1 %v1096_v53 }
  0x41   :  { %980 = vmatpush3.bf16.msra.mxu0 %v1097_v54 }
  0x42   :  { %1002 = vmatpush3.bf16.msra.mxu1 %v1098_v55  ;;  %981 = vmatprep.subr.bf16.mxu0 %v1099_v56  ;;  %v920_v55 = vld [vmem:[%s1259_s4] ss:$0 sm:$0xff] }
  0x43   :  { %1003 = vmatprep.subr.bf16.mxu1 %v1100_v57 }
  0x45   :  { %982 = vmatpush3.bf16.msra.mxu0 %v1101_v58 }
  0x46   :  { %1004 = vmatpush3.bf16.msra.mxu1 %v1102_v59  ;;  %983 = vmatprep.subr.bf16.mxu0 %v1103_v60 }
  0x47   :  { %1005 = vmatprep.subr.bf16.mxu1 %v1104_v61 }
  0x49   :  { %984 = vmatpush3.bf16.msra.mxu0 %v1105_v62 }
  0x4a   :  { %1006 = vmatpush3.bf16.msra.mxu1 %v1106_v63  ;;  %985 = vmatprep.subr.bf16.mxu0 %v1107_v0 }
  0x4b   :  { %1007 = vmatprep.subr.bf16.mxu1 %v1108_v1 }
  0x4d   :  { %986 = vmatpush3.bf16.msra.mxu0 %v1109_v2 }
  0x4e   :  { %1008 = vmatpush3.bf16.msra.mxu1 %v1110_v3  ;;  %987 = vmatprep.subr.bf16.mxu0 %v1111_v4 }
  0x4f   :  { %1009 = vmatprep.subr.bf16.mxu1 %v1112_v5 }
  0x51   :  { %988 = vmatpush3.bf16.msra.mxu0 %v1113_v6 }
  0x52   :  { %1010 = vmatpush3.bf16.msra.mxu1 %v1114_v7  ;;  %1026 = vmatprep.subr.bf16.mxu0 %v1154_v17 }
  0x54   :  { %683 = vmatmul.mubr.bf16.vlgmr.msra.gmra.mrb[4].mxu0 %v47_v14 }
  0x55   :  { %723 = vmatmul.mubr.bf16.vlgmr.msra.gmra.mrb[4].mxu1 %v49_v15  ;;  %1027 = vmatpush3.bf16.msra.mxu0 %v1115_v16 }
  0x56   :  { %1028 = vmatprep.subr.bf16.mxu0 %v1154_v17  ;;  %1042 = vmatprep.mubr.msk.bf16.mxu0 %vm1155_vm0, %v1154_v17 }
  0x59   :  { %1029 = vmatpush3.bf16.msra.mxu0 %v1116_v18 }
  0x5a   :  { %1030 = vmatprep.subr.bf16.mxu0 %v1154_v17 }
  0x5d   :  { %1031 = vmatpush3.bf16.msra.mxu0 %v1117_v19 }
  0x5e   :  { %1032 = vmatprep.subr.bf16.mxu0 %v1154_v17 }
  0x61   :  { %1033 = vmatpush3.bf16.msra.mxu0 %v1118_v20 }
  0x62   :  { %1034 = vmatprep.subr.bf16.mxu0 %v1154_v17 }
  0x65   :  { %1035 = vmatpush3.bf16.msra.mxu0 %v1119_v21 }
  0x66   :  { %1036 = vmatprep.subr.bf16.mxu0 %v1154_v17 }
  0x69   :  { %1037 = vmatpush3.bf16.msra.mxu0 %v1120_v22 }
  0x6a   :  { %1038 = vmatprep.subr.bf16.mxu0 %v1154_v17 }
  0x6d   :  { %1039 = vmatpush3.bf16.msra.mxu0 %v1121_v23 }
  0x6e   :  { %1040 = vmatprep.subr.bf16.mxu0 %v1154_v17 }
  0x71   :  { %1041 = vmatpush3.bf16.msra.mxu0 %v1122_v24 }
 0x107   :  { %v945_v25 = vpop.f32.mrb[0].mxu0 }
 0x108   :  { %v967_v26 = vpop.f32.mrb[0].mxu1  ;;  %v946_v28 = vpop.f32.mrb[1].mxu0 }
 0x109   :  { %v968_v29 = vpop.f32.mrb[1].mxu1  ;;  %v947_v30 = vadd.f32 %v946_v28, %v945_v25  ;;  %v948_v32 = vpop.f32.mrb[2].mxu0 }
 0x10a   :  { %v969_v31 = vadd.f32 %v968_v29, %v967_v26  ;;  %v970_v33 = vpop.f32.mrb[2].mxu1  ;;  %v949_v34 = vpop.f32.mrb[3].mxu0 }
 0x10b   :  { %v971_v35 = vpop.f32.mrb[3].mxu1  ;;  %v605_v36 = vadd.f32 %v947_v30, %v854_v27 }
 0x10d   :  { %v645_v37 = vadd.f32 %v969_v31, %v605_v36 }
 0x127   :  { %v989_v38 = vpop.f32.mrb[4].mxu0 }
 0x128   :  { %v1011_v39 = vpop.f32.mrb[4].mxu1  ;;  %v990_v40 = vpop.f32.mrb[5].mxu0 }
 0x129   :  { %v991_v41 = vadd.f32 %v990_v40, %v989_v38  ;;  %v1012_v42 = vpop.f32.mrb[5].mxu1  ;;  %v992_v43 = vpop.f32.mrb[6].mxu0 }
 0x12a   :  { %v1013_v44 = vadd.f32 %v1012_v42, %v1011_v39  ;;  %v1014_v45 = vpop.f32.mrb[6].mxu1  ;;  %v993_v46 = vpop.f32.mrb[7].mxu0 }
 0x12b   :  { %v685_v47 = vadd.f32 %v991_v41, %v645_v37  ;;  %v1015_v48 = vpop.f32.mrb[7].mxu1 }
 0x12d   :  { %v725_v49 = vadd.f32 %v1013_v44, %v685_v47 }
 0x12f   :  { %v919_v50 = vmul.f32 -1.442695, %v725_v49 }
 0x131   :  { %1123 = vpow2.f32 %v919_v50 }
 0x13b   :  { %v1124_v51 = vpop.eup %1123 }
 0x13c   :  { %v733_v52 = vadd.f32 1.0, %v1124_v51 }
 0x13e   :  { %1125 = vrcp.f32 %v733_v52 }
 0x148   :  { %v1126_v53 = vpop.eup %1125 }
 0x149   :  { %v736_v54 = vpack.c.bf16 %v1126_v53, %v1126_v53 }
 0x14b   :  { %1043 = vmatmul.mubr.bf16.vlgmr.msra.gmra.mrb[8].mxu0 %v736_v54 }
 0x21e   :  { %v842_v56 = vpop.f32.mrb[8].mxu0 }
 0x21f   :  { %v843_v57 = vadd.f32 %v920_v55, %v842_v56  ;;  %v1044_v58 = vpop.f32.mrb[9].mxu0 }
 0x220   :  { %v845_v59 = vpop.f32.mrb[10].mxu0 }
 0x221   :  { %848 = vst [vmem:[%s1260_s5] sm:$0xff] %v843_v57  ;;  %v1045_v60 = vpop.f32.mrb[11].mxu0 }
 0x222   :  { %853 = vsyncpa [#allocation3], 1 }

</bundles_post_ra>
